<compile_context>
chip_gen: v6e
topology: v6e:2x2x1
jax: 0.10.0
libtpu: 0.0.40
codegen_flags: <defaults>
</compile_context>

<pallas_src>
import functools

import jax
import jax.numpy as jnp
from jax.experimental import pallas as pl
from jax.experimental.pallas import tpu as pltpu


def _se_weight_kernel(x_ref, w1t_ref, b1_ref, w2t_ref, b2_ref, o_ref, acc_ref,
                      *, p, eps, inv_hw):
    """Grid = (batch_tile, hw_tile); hw is the reduction axis (innermost)."""
    hw_i = pl.program_id(1)

    @pl.when(hw_i == 0)
    def _init():
        acc_ref[...] = jnp.zeros_like(acc_ref)

    # ---- GeM "squeeze": accumulate sum_{H,W} clamp(x, eps)^p in f32 -------------
    xc = jnp.maximum(x_ref[...].astype(jnp.float32), eps)          # (Bb, C, Thw)
    if p == 3.0:
        xp = xc * xc * xc                                           # VPU, exact
    else:
        xp = jnp.exp(jnp.log(xc) * p)                               # xc > 0 after clamp
    acc_ref[...] += jnp.sum(xp, axis=2)                             # (Bb, C), XLU reduce

    # ---- last HW tile: GeM root -> fc1 -> ReLU -> fc2 -> sigmoid ----------------
    @pl.when(hw_i == pl.num_programs(1) - 1)
    def _finalize():
        mean_p = acc_ref[...] * inv_hw                              # (Bb, C), >= eps^p
        pooled = jnp.exp(jnp.log(mean_p) * (1.0 / p))               # GeM root

        # Tiny FCs done exactly in f32 on the VPU (broadcast-multiply + sublane reduce);
        # avoids an MXU weight push / result relayout for an N<=Bb matvec, and runs only
        # once per batch block so it is invisible next to the HBM stream of x.
        z1 = jnp.sum(pooled[:, :, None] * w1t_ref[...][None, :, :], axis=1)   # (Bb, Cr)
        z1 = jnp.maximum(z1 + b1_ref[...], 0.0)
        z2 = jnp.sum(z1[:, :, None] * w2t_ref[...][None, :, :], axis=1)       # (Bb, C)
        z2 = z2 + b2_ref[...]
        o_ref[...] = (1.0 / (1.0 + jnp.exp(-z2))).astype(o_ref.dtype)


def _choose_blocks(B, C, HW, itemsize, budget_bytes=6 * 1024 * 1024):
    """Pick (block_b, block_hw) dividing (B, HW) with one x block <= ~budget.

    Double-buffered input (2x block) + params + scratch stays well under the
    32 MiB default scoped VMEM limit on v5e/v6e and 64 MiB physical VMEM on v7x.
    """
    slab = C * HW * itemsize                      # one sample's (C, HW) slab
    if slab <= budget_bytes:
        block_hw = HW
        block_b = max(1, min(B, budget_bytes // slab))
        while B % block_b:                        # must divide B exactly (no padding)
            block_b -= 1
    else:
        block_b = 1
        # Largest multiple of 128 that divides HW and fits the budget.
        max_hw = max(128, budget_bytes // (C * itemsize))
        block_hw = 0
        t = 128
        while t <= min(HW, max_hw):
            if HW % t == 0:
                block_hw = t
            t += 128
        if block_hw == 0:
            # TODO(synk): HW not 128-divisible and slab over budget -> fall back to a
            # full row; huge HW of this form may need a raised vmem_limit_bytes.
            block_hw = HW
    return block_b, block_hw


@functools.partial(jax.jit, static_argnames=("p", "eps", "block_b", "block_hw"))
def se_weight(x, w1, b1, w2, b2, *, p=3.0, eps=1e-6, block_b=None, block_hw=None):
    """SEWeightModule forward. x: (B,C,H,W); returns sigmoid gates (B,C,1,1)."""
    B, C, H, W = x.shape
    Cr = w1.shape[0]
    HW = H * W

    x_flat = x.reshape(B, C, HW)
    w1t = w1.astype(jnp.float32).T.reshape(C, Cr)     # fc1 weight, transposed
    w2t = w2.astype(jnp.float32).T.reshape(Cr, C)     # fc2 weight, transposed
    b1r = b1.astype(jnp.float32).reshape(1, Cr)
    b2r = b2.astype(jnp.float32).reshape(1, C)

    auto_b, auto_hw = _choose_blocks(B, C, HW, x.dtype.itemsize)
    block_b = auto_b if block_b is None else block_b
    block_hw = auto_hw if block_hw is None else block_hw
    grid = (B // block_b, HW // block_hw)

    kernel = functools.partial(
        _se_weight_kernel, p=float(p), eps=float(eps), inv_hw=1.0 / HW)

    gates = pl.pallas_call(
        kernel,
        out_shape=jax.ShapeDtypeStruct((B, C), x.dtype),
        grid_spec=pltpu.PrefetchScalarGridSpec(
            num_scalar_prefetch=0,
            grid=grid,
            in_specs=[
                pl.BlockSpec((block_b, C, block_hw), lambda b, h: (b, 0, h)),  # x slab
                pl.BlockSpec((C, Cr), lambda b, h: (0, 0)),                    # fc1 W^T
                pl.BlockSpec((1, Cr), lambda b, h: (0, 0)),                    # fc1 bias
                pl.BlockSpec((Cr, C), lambda b, h: (0, 0)),                    # fc2 W^T
                pl.BlockSpec((1, C), lambda b, h: (0, 0)),                     # fc2 bias
            ],
            out_specs=pl.BlockSpec((block_b, C), lambda b, h: (b, 0)),
            scratch_shapes=[pltpu.VMEM((block_b, C), jnp.float32)],
        ),
        compiler_params=pltpu.CompilerParams(
            dimension_semantics=("parallel", "arbitrary"),
        ),
        cost_estimate=pl.CostEstimate(
            flops=4 * B * C * HW + 4 * B * C * Cr,
            transcendentals=3 * B * C,
            bytes_accessed=B * C * HW * x.dtype.itemsize
                           + B * C * x.dtype.itemsize
                           + (2 * C * Cr + C + Cr) * 4,
        ),
    )(x_flat, w1t, b1r, w2t, b2r)

    return gates.reshape(B, C, 1, 1)


def _reference(x, w1, b1, w2, b2, p=3.0, eps=1e-6):
    """Pure-JAX reference matching the PyTorch SEWeightModule forward."""
    xf = x.astype(jnp.float32)
    pooled = jnp.mean(jnp.maximum(xf, eps) ** p, axis=(2, 3)) ** (1.0 / p)      # (B, C)
    z1 = jnp.maximum(
        jnp.dot(pooled, w1.T, precision=jax.lax.Precision.HIGHEST) + b1, 0.0)   # (B, Cr)
    z2 = jnp.dot(z1, w2.T, precision=jax.lax.Precision.HIGHEST) + b2            # (B, C)
    return jax.nn.sigmoid(z2)[:, :, None, None].astype(x.dtype)                 # (B, C, 1, 1)


def _make_params(key, C, Cr):
    kw1, kb1, kw2, kb2 = jax.random.split(key, 4)
    # PyTorch Conv2d default init: U(-1/sqrt(fan_in), 1/sqrt(fan_in)), fan_in = C_in (1x1).
    lim1 = 1.0 / (C ** 0.5)
    w1 = jax.random.uniform(kw1, (Cr, C), jnp.float32, -lim1, lim1)
    b1 = jax.random.uniform(kb1, (Cr,), jnp.float32, -lim1, lim1)
    lim2 = 1.0 / (Cr ** 0.5)
    w2 = jax.random.uniform(kw2, (C, Cr), jnp.float32, -lim2, lim2)
    b2 = jax.random.uniform(kb2, (C,), jnp.float32, -lim2, lim2)
    return w1, b1, w2, b2


def _check(out, ref, B, C):
    assert out.shape == (B, C, 1, 1)
    # Outputs are sigmoid-bounded in (0,1); 1e-4 absorbs pow-vs-mul / EUP noise while
    # still catching any real bug (wrong pooling / weight orientation >> 1e-2).
    err = float(jnp.max(jnp.abs(out.astype(jnp.float32) - ref.astype(jnp.float32))))
    assert jnp.allclose(out, ref, atol=1e-4, rtol=1e-4), f"mismatch vs reference, max err {err}"


if __name__ == "__main__":
    key = jax.random.PRNGKey(0)
    k1, k2, kp = jax.random.split(key, 3)

    # ---- Test 1: small shapes consistent with the module (channels >= reduction=16). --
    B, C, H, W = 2, 64, 16, 16
    reduction = 16
    Cr = C // reduction  # 4
    w1, b1, w2, b2 = _make_params(kp, C, Cr)

    x = jax.random.normal(k1, (B, C, H, W), dtype=jnp.float32)
    out = jax.block_until_ready(se_weight(x, w1, b1, w2, b2))
    _check(out, _reference(x, w1, b1, w2, b2), B, C)

    # ---- Test 2: force batch tiling + HW-reduction tiling (exercises accumulator). ----
    B2 = 4
    x2 = jax.random.normal(k2, (B2, C, H, W), dtype=jnp.float32)
    out2 = jax.block_until_ready(
        se_weight(x2, w1, b1, w2, b2, block_b=2, block_hw=128))
    _check(out2, _reference(x2, w1, b1, w2, b2), B2, C)

    print("KERNEL_OK")
</pallas_src>

<mosaic_0001>
module attributes {stable_mosaic.version = 11 : i64} {
  func.func @_se_weight_kernel(%arg0: i32, %arg1: i32, %arg2: memref<2x64x256xf32, #tpu.memory_space<vmem>>, %arg3: memref<64x4xf32, #tpu.memory_space<vmem>>, %arg4: memref<1x4xf32, #tpu.memory_space<vmem>>, %arg5: memref<4x64xf32, #tpu.memory_space<vmem>>, %arg6: memref<1x64xf32, #tpu.memory_space<vmem>>, %arg7: memref<2x64xf32, #tpu.memory_space<vmem>>, %arg8: memref<2x64xf32, #tpu.memory_space<vmem>>) attributes {dimension_semantics = [#tpu.dimension_semantics<parallel>, #tpu.dimension_semantics<arbitrary>], iteration_bounds = array<i64: 1, 1>, scalar_prefetch = 0 : i64, scratch_operands = 1 : i64, tpu.core_type = #tpu.core_type<tc>, window_params = [{transform_indices = @transform_0, window_bounds = array<i64: 2, 64, 256>}, {pipeline_mode = #tpu.pipeline_mode<synchronous>, transform_indices = @transform_1, window_bounds = array<i64: 64, 4>}, {pipeline_mode = #tpu.pipeline_mode<synchronous>, transform_indices = @transform_2, window_bounds = array<i64: 1, 4>}, {pipeline_mode = #tpu.pipeline_mode<synchronous>, transform_indices = @transform_3, window_bounds = array<i64: 4, 64>}, {pipeline_mode = #tpu.pipeline_mode<synchronous>, transform_indices = @transform_4, window_bounds = array<i64: 1, 64>}, {transform_indices = @transform_5, window_bounds = array<i64: 2, 64>}]} {
    %c0_i32 = arith.constant 0 : i32
    %0 = arith.cmpi eq, %arg1, %c0_i32 : i32
    %1 = arith.extui %0 : i1 to i32
    %c0_i32_0 = arith.constant 0 : i32
    %2 = arith.cmpi ne, %1, %c0_i32_0 : i32
    scf.if %2 {
      %cst_10 = arith.constant 0.000000e+00 : f32
      %15 = vector.broadcast %cst_10 : f32 to vector<2x64xf32>
      %c0_11 = arith.constant 0 : index
      %c0_12 = arith.constant 0 : index
      %16 = vector.load %arg8[%c0_11, %c0_12] : memref<2x64xf32, #tpu.memory_space<vmem>>, vector<2x64xf32>
      tpu.vector_store %arg8[%c0_11, %c0_12], %15 {strides = array<i32>} : memref<2x64xf32, #tpu.memory_space<vmem>>, vector<2x64xf32>,
    } else {
    }
    %c0 = arith.constant 0 : index
    %c0_1 = arith.constant 0 : index
    %c0_2 = arith.constant 0 : index
    %3 = vector.load %arg2[%c0, %c0_1, %c0_2] : memref<2x64x256xf32, #tpu.memory_space<vmem>>, vector<2x64x256xf32>
    %cst = arith.constant 9.99999997E-7 : f32
    %4 = vector.broadcast %cst : f32 to vector<2x64x256xf32>
    %5 = arith.maximumf %3, %4 : vector<2x64x256xf32>
    %6 = arith.mulf %5, %5 : vector<2x64x256xf32>
    %7 = arith.mulf %6, %5 : vector<2x64x256xf32>
    %c0_3 = arith.constant 0 : index
    %c0_4 = arith.constant 0 : index
    %8 = vector.load %arg8[%c0_3, %c0_4] : memref<2x64xf32, #tpu.memory_space<vmem>>, vector<2x64xf32>
    %cst_5 = arith.constant dense<0.000000e+00> : vector<2x64xf32>
    %9 = vector.multi_reduction <add>, %7, %cst_5 [2] : vector<2x64x256xf32> to vector<2x64xf32>
    %10 = arith.addf %8, %9 : vector<2x64xf32>
    %c0_6 = arith.constant 0 : index
    %c0_7 = arith.constant 0 : index
    %11 = vector.load %arg8[%c0_6, %c0_7] : memref<2x64xf32, #tpu.memory_space<vmem>>, vector<2x64xf32>
    tpu.vector_store %arg8[%c0_6, %c0_7], %10 {strides = array<i32>} : memref<2x64xf32, #tpu.memory_space<vmem>>, vector<2x64xf32>,
    %c0_i32_8 = arith.constant 0 : i32
    %12 = arith.cmpi eq, %arg1, %c0_i32_8 : i32
    %13 = arith.extui %12 : i1 to i32
    %c0_i32_9 = arith.constant 0 : i32
    %14 = arith.cmpi ne, %13, %c0_i32_9 : i32
    scf.if %14 {
      %c0_10 = arith.constant 0 : index
      %c0_11 = arith.constant 0 : index
      %15 = vector.load %arg8[%c0_10, %c0_11] : memref<2x64xf32, #tpu.memory_space<vmem>>, vector<2x64xf32>
      %cst_12 = arith.constant 3.906250e-03 : f32
      %16 = vector.broadcast %cst_12 : f32 to vector<2x64xf32>
      %17 = arith.mulf %15, %16 : vector<2x64xf32>
      %18 = math.log %17 : vector<2x64xf32>
      %cst_13 = arith.constant 0.333333343 : f32
      %19 = vector.broadcast %cst_13 : f32 to vector<2x64xf32>
      %20 = arith.mulf %18, %19 : vector<2x64xf32>
      %21 = math.exp %20 : vector<2x64xf32>
      %22 = vector.shape_cast %21 : vector<2x64xf32> to vector<2x64x1xf32>
      %c0_14 = arith.constant 0 : index
      %c0_15 = arith.constant 0 : index
      %23 = vector.load %arg3[%c0_14, %c0_15] : memref<64x4xf32, #tpu.memory_space<vmem>>, vector<64x4xf32>
      %24 = vector.shape_cast %23 : vector<64x4xf32> to vector<1x64x4xf32>
      %25 = vector.broadcast %22 : vector<2x64x1xf32> to vector<2x64x4xf32>
      %26 = vector.broadcast %24 : vector<1x64x4xf32> to vector<2x64x4xf32>
      %27 = arith.mulf %25, %26 : vector<2x64x4xf32>
      %cst_16 = arith.constant dense<0.000000e+00> : vector<2x4xf32>
      %28 = vector.multi_reduction <add>, %27, %cst_16 [1] : vector<2x64x4xf32> to vector<2x4xf32>
      %c0_17 = arith.constant 0 : index
      %c0_18 = arith.constant 0 : index
      %29 = vector.load %arg4[%c0_17, %c0_18] : memref<1x4xf32, #tpu.memory_space<vmem>>, vector<1x4xf32>
      %30 = vector.broadcast %29 : vector<1x4xf32> to vector<2x4xf32>
      %31 = arith.addf %28, %30 : vector<2x4xf32>
      %cst_19 = arith.constant 0.000000e+00 : f32
      %32 = vector.broadcast %cst_19 : f32 to vector<2x4xf32>
      %33 = arith.maximumf %31, %32 : vector<2x4xf32>
      %34 = vector.shape_cast %33 : vector<2x4xf32> to vector<2x4x1xf32>
      %c0_20 = arith.constant 0 : index
      %c0_21 = arith.constant 0 : index
      %35 = vector.load %arg5[%c0_20, %c0_21] : memref<4x64xf32, #tpu.memory_space<vmem>>, vector<4x64xf32>
      %36 = vector.shape_cast %35 : vector<4x64xf32> to vector<1x4x64xf32>
      %37 = vector.broadcast %34 : vector<2x4x1xf32> to vector<2x4x64xf32>
      %38 = vector.broadcast %36 : vector<1x4x64xf32> to vector<2x4x64xf32>
      %39 = arith.mulf %37, %38 : vector<2x4x64xf32>
      %cst_22 = arith.constant dense<0.000000e+00> : vector<2x64xf32>
      %40 = vector.multi_reduction <add>, %39, %cst_22 [1] : vector<2x4x64xf32> to vector<2x64xf32>
      %c0_23 = arith.constant 0 : index
      %c0_24 = arith.constant 0 : index
      %41 = vector.load %arg6[%c0_23, %c0_24] : memref<1x64xf32, #tpu.memory_space<vmem>>, vector<1x64xf32>
      %42 = vector.broadcast %41 : vector<1x64xf32> to vector<2x64xf32>
      %43 = arith.addf %40, %42 : vector<2x64xf32>
      %cst_25 = arith.constant 0.000000e+00 : f32
      %44 = vector.broadcast %cst_25 : f32 to vector<2x64xf32>
      %45 = arith.subf %44, %43 : vector<2x64xf32>
      %46 = math.exp %45 : vector<2x64xf32>
      %cst_26 = arith.constant 1.000000e+00 : f32
      %47 = vector.broadcast %cst_26 : f32 to vector<2x64xf32>
      %48 = arith.addf %47, %46 : vector<2x64xf32>
      %cst_27 = arith.constant 1.000000e+00 : f32
      %49 = vector.broadcast %cst_27 : f32 to vector<2x64xf32>
      %50 = arith.divf %49, %48 : vector<2x64xf32>
      %c0_28 = arith.constant 0 : index
      %c0_29 = arith.constant 0 : index
      %51 = vector.load %arg7[%c0_28, %c0_29] : memref<2x64xf32, #tpu.memory_space<vmem>>, vector<2x64xf32>
      tpu.vector_store %arg7[%c0_28, %c0_29], %50 {strides = array<i32>} : memref<2x64xf32, #tpu.memory_space<vmem>>, vector<2x64xf32>,
    } else {
    }
    return
  }
  func.func @transform_0(%arg0: i32, %arg1: i32) -> (i32, i32, i32) {
    %c0_i32 = arith.constant 0 : i32
    %c0_i32_0 = arith.constant 0 : i32
    return %arg0, %c0_i32, %arg1 : i32, i32, i32
  }
  func.func @transform_1(%arg0: i32, %arg1: i32) -> (i32, i32) {
    %c0_i32 = arith.constant 0 : i32
    %c0_i32_0 = arith.constant 0 : i32
    %c0_i32_1 = arith.constant 0 : i32
    return %c0_i32, %c0_i32_0 : i32, i32
  }
  func.func @transform_2(%arg0: i32, %arg1: i32) -> (i32, i32) {
    %c0_i32 = arith.constant 0 : i32
    %c0_i32_0 = arith.constant 0 : i32
    %c0_i32_1 = arith.constant 0 : i32
    return %c0_i32, %c0_i32_0 : i32, i32
  }
  func.func @transform_3(%arg0: i32, %arg1: i32) -> (i32, i32) {
    %c0_i32 = arith.constant 0 : i32
    %c0_i32_0 = arith.constant 0 : i32
    %c0_i32_1 = arith.constant 0 : i32
    return %c0_i32, %c0_i32_0 : i32, i32
  }
  func.func @transform_4(%arg0: i32, %arg1: i32) -> (i32, i32) {
    %c0_i32 = arith.constant 0 : i32
    %c0_i32_0 = arith.constant 0 : i32
    %c0_i32_1 = arith.constant 0 : i32
    return %c0_i32, %c0_i32_0 : i32, i32
  }
  func.func @transform_5(%arg0: i32, %arg1: i32) -> (i32, i32) {
    %c0_i32 = arith.constant 0 : i32
    %c0_i32_0 = arith.constant 0 : i32
    return %arg0, %c0_i32 : i32, i32
  }
}

</mosaic_0001>

<bundles_post_ra>
// kernel: se_weight.1
= control target key start
LH: loop header
LB: loop body
LE: loop exit
PB: predicated region body
PF: predicated region fallthrough
CT: control target
= control target key end

     0   :  { %s801_s0 = inlined_call_operand.vmem [shape: f32[2,64,256], index: 0, kind: input, shape index: {}]   ;;  %s802_s1 = inlined_call_operand.vmem [shape: f32[64,4], index: 1, kind: input, shape index: {}]   ;;  %s803_s2 = inlined_call_operand.vmem [shape: f32[1,4], index: 2, kind: input, shape index: {}]   ;;  %s804_s3 = inlined_call_operand.vmem [shape: f32[4,64], index: 3, kind: input, shape index: {}]   ;;  %s805_s4 = inlined_call_operand.vmem [shape: f32[1,64], index: 4, kind: input, shape index: {}]   ;;  %s806_s5 = inlined_call_operand.hbm [shape: f32[2,64], index: 5, kind: output, shape index: {}]  }
   0x1   :  { %v43_v0 = vld [vmem:[%s801_s0 + $0x80] sm:$0xff]  ;;  %v44_v1 = vld [vmem:[%s801_s0 + $0x88] sm:$0xff]  ;;  %v45_v6 = vld [vmem:[%s801_s0 + $0x90] sm:$0xff] }
   0x2   :  { %v27_v2 = vld [vmem:[%s801_s0] sm:$0xff]  ;;  %v75_v3 = vmax.f32 %v43_v0, 1e-06  ;;  %v76_v4 = vmax.f32 %v44_v1, 1e-06  ;;  %v28_v5 = vld [vmem:[%s801_s0 + $0x8] sm:$0xff] }
   0x3   :  { %v59_v7 = vmax.f32 %v27_v2, 1e-06  ;;  %v60_v8 = vmax.f32 %v28_v5, 1e-06  ;;  %v46_v9 = vld [vmem:[%s801_s0 + $0x98] sm:$0xff]  ;;  %v29_v10 = vld [vmem:[%s801_s0 + $0x10] sm:$0xff] }
   0x4   :  { %v107_v11 = vmul.f32 %v75_v3, %v75_v3  ;;  %v108_v12 = vmul.f32 %v76_v4, %v76_v4  ;;  %v77_v13 = vmax.f32 %v45_v6, 1e-06  ;;  %v78_v14 = vmax.f32 %v46_v9, 1e-06  ;;  %v30_v15 = vld [vmem:[%s801_s0 + $0x18] sm:$0xff]  ;;  %v47_v20 = vld [vmem:[%s801_s0 + $0xa0] sm:$0xff] }
   0x5   :  { %v91_v16 = vmul.f32 %v59_v7, %v59_v7  ;;  %v92_v17 = vmul.f32 %v60_v8, %v60_v8  ;;  %v61_v18 = vmax.f32 %v29_v10, 1e-06  ;;  %v62_v19 = vmax.f32 %v30_v15, 1e-06  ;;  %v48_v25 = vld [vmem:[%s801_s0 + $0xa8] sm:$0xff]  ;;  %v31_v30 = vld [vmem:[%s801_s0 + $0x20] sm:$0xff] }
   0x6   :  { %v139_v21 = vmul.f32 %v107_v11, %v75_v3  ;;  %v140_v22 = vmul.f32 %v108_v12, %v76_v4  ;;  %v109_v23 = vmul.f32 %v77_v13, %v77_v13  ;;  %v110_v24 = vmul.f32 %v78_v14, %v78_v14  ;;  %v32_v31 = vld [vmem:[%s801_s0 + $0x28] sm:$0xff]  ;;  %v49_v36 = vld [vmem:[%s801_s0 + $0xb0] sm:$0xff]  ;;  %v50_v37 = vld [vmem:[%s801_s0 + $0xb8] sm:$0xff] }
   0x7   :  { %v123_v26 = vmul.f32 %v91_v16, %v59_v7  ;;  %v124_v27 = vmul.f32 %v92_v17, %v60_v8  ;;  %v93_v28 = vmul.f32 %v61_v18, %v61_v18  ;;  %v94_v29 = vmul.f32 %v62_v19, %v62_v19  ;;  %v33_v42 = vld [vmem:[%s801_s0 + $0x30] sm:$0xff]  ;;  %v34_v47 = vld [vmem:[%s801_s0 + $0x38] sm:$0xff]  ;;  %v51_v52 = vld [vmem:[%s801_s0 + $0xc0] sm:$0xff] }
   0x8   :  { %v180_v32 = vadd.f32 %v140_v22, %v139_v21  ;;  %v141_v33 = vmul.f32 %v109_v23, %v77_v13  ;;  %v142_v34 = vmul.f32 %v110_v24, %v78_v14  ;;  %v79_v35 = vmax.f32 %v47_v20, 1e-06  ;;  %v52_v61 = vld [vmem:[%s801_s0 + $0xc8] sm:$0xff] }
   0x9   :  { %v156_v38 = vadd.f32 %v124_v27, %v123_v26  ;;  %v125_v39 = vmul.f32 %v93_v28, %v61_v18  ;;  %v126_v40 = vmul.f32 %v94_v29, %v62_v19  ;;  %v80_v41 = vmax.f32 %v48_v25, 1e-06 }
   0xa   :  { %181 = vadd.xlane.f32.xlu1 %v180_v32  ;;  %v183_v43 = vadd.f32 %v142_v34, %v141_v33  ;;  %v111_v44 = vmul.f32 %v79_v35, %v79_v35  ;;  %v63_v45 = vmax.f32 %v31_v30, 1e-06  ;;  %v64_v46 = vmax.f32 %v32_v31, 1e-06 }
   0xb   :  { %157 = vadd.xlane.f32.xlu0 %v156_v38  ;;  %v159_v48 = vadd.f32 %v126_v40, %v125_v39  ;;  %v112_v49 = vmul.f32 %v80_v41, %v80_v41  ;;  %v81_v50 = vmax.f32 %v49_v36, 1e-06  ;;  %v82_v51 = vmax.f32 %v50_v37, 1e-06 }
   0xc   :  { %v143_v53 = vmul.f32 %v111_v44, %v79_v35  ;;  %v95_v54 = vmul.f32 %v63_v45, %v63_v45  ;;  %v96_v55 = vmul.f32 %v64_v46, %v64_v46  ;;  %v65_v56 = vmax.f32 %v33_v42, 1e-06 }
   0xd   :  { %v144_v57 = vmul.f32 %v112_v49, %v80_v41  ;;  %v113_v58 = vmul.f32 %v81_v50, %v81_v50  ;;  %v114_v59 = vmul.f32 %v82_v51, %v82_v51  ;;  %v66_v60 = vmax.f32 %v34_v47, 1e-06 }
   0xe   :  { %10 = vsyncpa [#allocation4], 0  ;;  %184 = vadd.xlane.f32.xlu1 %v183_v43  ;;  %v127_v62 = vmul.f32 %v95_v54, %v63_v45  ;;  %v128_v63 = vmul.f32 %v96_v55, %v64_v46  ;;  %v97_v0 = vmul.f32 %v65_v56, %v65_v56  ;;  %v83_v1 = vmax.f32 %v51_v52, 1e-06  ;;  %v35_v2 = vld [vmem:[%s801_s0 + $0x40] sm:$0xff]  ;;  %v36_v3 = vld [vmem:[%s801_s0 + $0x48] sm:$0xff] }
   0xf   :  { %160 = vadd.xlane.f32.xlu0 %v159_v48  ;;  %v186_v4 = vadd.f32 %v144_v57, %v143_v53  ;;  %v145_v5 = vmul.f32 %v113_v58, %v81_v50  ;;  %v146_v6 = vmul.f32 %v114_v59, %v82_v51  ;;  %v98_v7 = vmul.f32 %v66_v60, %v66_v60  ;;  %v53_v8 = vld [vmem:[%s801_s0 + $0xd0] sm:$0xff]  ;;  %v54_v9 = vld [vmem:[%s801_s0 + $0xd8] sm:$0xff]  ;;  %v55_v24 = vld [vmem:[%s801_s0 + $0xe0] sm:$0xff] }
  0x10   :  { %v162_v10 = vadd.f32 %v128_v63, %v127_v62  ;;  %v129_v11 = vmul.f32 %v97_v0, %v65_v56  ;;  %v84_v12 = vmax.f32 %v52_v61, 1e-06  ;;  %v115_v13 = vmul.f32 %v83_v1, %v83_v1  ;;  %v37_v14 = vld [vmem:[%s801_s0 + $0x50] sm:$0xff]  ;;  %v38_v19 = vld [vmem:[%s801_s0 + $0x58] sm:$0xff]  ;;  %v56_v33 = vld [vmem:[%s801_s0 + $0xe8] sm:$0xff] }
  0x11   :  { %v189_v15 = vadd.f32 %v146_v6, %v145_v5  ;;  %v130_v16 = vmul.f32 %v98_v7, %v66_v60  ;;  %v67_v17 = vmax.f32 %v35_v2, 1e-06  ;;  %v68_v18 = vmax.f32 %v36_v3, 1e-06  ;;  %v39_v38 = vld [vmem:[%s801_s0 + $0x60] sm:$0xff]  ;;  %v40_v39 = vld [vmem:[%s801_s0 + $0x68] sm:$0xff] }
  0x12   :  { %187 = vadd.xlane.f32.xlu1 %v186_v4  ;;  %v116_v20 = vmul.f32 %v84_v12, %v84_v12  ;;  %v147_v21 = vmul.f32 %v115_v13, %v83_v1  ;;  %v85_v22 = vmax.f32 %v53_v8, 1e-06  ;;  %v86_v23 = vmax.f32 %v54_v9, 1e-06  ;;  %v57_v44 = vld [vmem:[%s801_s0 + $0xf0] sm:$0xff]  ;;  %v58_v45 = vld [vmem:[%s801_s0 + $0xf8] sm:$0xff] }
  0x13   :  { %163 = vadd.xlane.f32.xlu0 %v162_v10  ;;  %v165_v25 = vadd.f32 %v130_v16, %v129_v11  ;;  %v99_v26 = vmul.f32 %v67_v17, %v67_v17  ;;  %v100_v27 = vmul.f32 %v68_v18, %v68_v18  ;;  %v69_v28 = vmax.f32 %v37_v14, 1e-06  ;;  %v41_v50 = vld [vmem:[%s801_s0 + $0x70] sm:$0xff]  ;;  %v42_v55 = vld [vmem:[%s801_s0 + $0x78] sm:$0xff] }
  0x14   :  { %v148_v29 = vmul.f32 %v116_v20, %v84_v12  ;;  %v117_v30 = vmul.f32 %v85_v22, %v85_v22  ;;  %v118_v31 = vmul.f32 %v86_v23, %v86_v23  ;;  %v70_v32 = vmax.f32 %v38_v19, 1e-06 }
  0x15   :  { %v131_v34 = vmul.f32 %v99_v26, %v67_v17  ;;  %v132_v35 = vmul.f32 %v100_v27, %v68_v18  ;;  %v101_v36 = vmul.f32 %v69_v28, %v69_v28  ;;  %v87_v37 = vmax.f32 %v55_v24, 1e-06 }
  0x16   :  { %190 = vadd.xlane.f32.xlu1 %v189_v15  ;;  %v192_v40 = vadd.f32 %v148_v29, %v147_v21  ;;  %v149_v41 = vmul.f32 %v117_v30, %v85_v22  ;;  %v150_v42 = vmul.f32 %v118_v31, %v86_v23  ;;  %v102_v43 = vmul.f32 %v70_v32, %v70_v32 }
  0x17   :  { %166 = vadd.xlane.f32.xlu0 %v165_v25  ;;  %v168_v46 = vadd.f32 %v132_v35, %v131_v34  ;;  %v133_v47 = vmul.f32 %v101_v36, %v69_v28  ;;  %v88_v48 = vmax.f32 %v56_v33, 1e-06  ;;  %v119_v49 = vmul.f32 %v87_v37, %v87_v37 }
  0x18   :  { %v195_v51 = vadd.f32 %v150_v42, %v149_v41  ;;  %v134_v52 = vmul.f32 %v102_v43, %v70_v32  ;;  %v71_v53 = vmax.f32 %v39_v38, 1e-06  ;;  %v72_v54 = vmax.f32 %v40_v39, 1e-06 }
  0x19   :  { %v120_v56 = vmul.f32 %v88_v48, %v88_v48  ;;  %v151_v57 = vmul.f32 %v119_v49, %v87_v37  ;;  %v89_v58 = vmax.f32 %v57_v44, 1e-06  ;;  %v90_v59 = vmax.f32 %v58_v45, 1e-06 }
  0x1a   :  { %193 = vadd.xlane.f32.xlu1 %v192_v40  ;;  %v171_v60 = vadd.f32 %v134_v52, %v133_v47  ;;  %v103_v61 = vmul.f32 %v71_v53, %v71_v53  ;;  %v104_v62 = vmul.f32 %v72_v54, %v72_v54  ;;  %v73_v63 = vmax.f32 %v41_v50, 1e-06 }
  0x1b   :  { %169 = vadd.xlane.f32.xlu0 %v168_v46  ;;  %v152_v0 = vmul.f32 %v120_v56, %v88_v48  ;;  %v121_v1 = vmul.f32 %v89_v58, %v89_v58  ;;  %v122_v2 = vmul.f32 %v90_v59, %v90_v59  ;;  %v74_v3 = vmax.f32 %v42_v55, 1e-06 }
  0x1c   :  { %v135_v4 = vmul.f32 %v103_v61, %v71_v53  ;;  %v136_v5 = vmul.f32 %v104_v62, %v72_v54  ;;  %v105_v6 = vmul.f32 %v73_v63, %v73_v63  ;;  %vm25_vm0 = vcmask 517120  }
  0x1d   :  { %v106_v7 = vmul.f32 %v74_v3, %v74_v3  ;;  %v198_v8 = vadd.f32 %v152_v0, %v151_v57  ;;  %v153_v9 = vmul.f32 %v121_v1, %v89_v58  ;;  %v154_v10 = vmul.f32 %v122_v2, %v90_v59 }
  0x1e   :  { %196 = vadd.xlane.f32.xlu1 %v195_v51  ;;  %v174_v11 = vadd.f32 %v136_v5, %v135_v4  ;;  %v137_v12 = vmul.f32 %v105_v6, %v73_v63  ;;  %v589_v16 = vmov 0.0   ;;  %v220_v21 = vlaneseq }
  0x1f   :  { %172 = vadd.xlane.f32.xlu0 %v171_v60  ;;  %v138_v13 = vmul.f32 %v106_v7, %v74_v3  ;;  %v201_v14 = vadd.f32 %v154_v10, %v153_v9  ;;  %26 = vst.msk [vmem:[#allocation2] sm:$0x3] %vm25_vm0, %v589_v16  ;;  %vm231_vm1 = vcmask 130112   ;;  %vm238_vm2 = vcmask 195712  }
  0x20   :  { %v221_v24 = vand.u32 127, %v220_v21  ;;  %v718_v29 = vshrl.u32 %v220_v21, 7  ;;  %vm245_vm3 = vcmask 261312   ;;  %vm252_vm4 = vcmask 326912  }
  0x21   :  { %v177_v15 = vadd.f32 %v138_v13, %v137_v12  ;;  %vm259_vm5 = vcmask 392512   ;;  %vm266_vm6 = vcmask 458112   ;;  %vm273_vm7 = vcmask 523712  }
  0x22   :  { %199 = vadd.xlane.f32.xlu1 %v198_v8  ;;  %v226_v26 = vadd.s32 4294967288, %v221_v24  ;;  %v233_v28 = vadd.s32 4294967280, %v221_v24  ;;  %v240_v30 = vadd.s32 4294967272, %v221_v24  ;;  %v247_v31 = vadd.s32 4294967264, %v221_v24 }
  0x23   :  { %175 = vadd.xlane.f32.xlu0 %v174_v11  ;;  %v254_v35 = vadd.s32 4294967256, %v221_v24  ;;  %v261_v37 = vadd.s32 4294967248, %v221_v24  ;;  %v224_v38 = vsub.s32 %v221_v24, %v718_v29  ;;  %v268_v45 = vadd.s32 4294967240, %v221_v24 }
  0x24   :  { %v229_v33 = vsub.s32 %v226_v26, %v718_v29  ;;  %v236_v36 = vsub.s32 %v233_v28, %v718_v29  ;;  %v243_v39 = vsub.s32 %v240_v30, %v718_v29  ;;  %v250_v40 = vsub.s32 %v247_v31, %v718_v29 }
  0x25   :  { %v257_v43 = vsub.s32 %v254_v35, %v718_v29  ;;  %v264_v48 = vsub.s32 %v261_v37, %v718_v29  ;;  %v271_v60 = vsub.s32 %v268_v45, %v718_v29  ;;  %vm314_vm8 = vcmask 1041409   ;;  %v401_v35 = vld [vmem:[%s802_s1 + $0x8] sm:$0xff]  ;;  %v402_v37 = vld [vmem:[%s802_s1 + $0x10] sm:$0xff] }
  0x26   :  { %202 = vadd.xlane.f32.xlu1 %v201_v14  ;;  %v155_v16 = vld [vmem:[#allocation2] sm:$0x3]  ;;  %v367_v26 = vsub.s32 1, %v718_v29  ;;  %v742_v30 = vsub.s32 0, %v718_v29  ;;  %vm424_vm9 = vcmask 31744   ;;  %vm495_vm10 = vcmask 519168  }
  0x27   :  { %178 = vadd.xlane.f32.xlu0 %v177_v15 }
  0x93   :  { %v182_v17 = vpop.xlane.xlu1 %181 }
  0x94   :  { %v158_v18 = vpop.xlane.xlu0 %157  ;;  %v278_v49 = vrot.slane %v182_v17, %v224_v38 }
  0x95   :  { %v225_v52 = vrot.slane %v158_v18, %v224_v38 }
  0x97   :  { %v185_v19 = vpop.xlane.xlu1 %184 }
  0x98   :  { %v161_v20 = vpop.xlane.xlu0 %160  ;;  %v282_v42 = vrot.slane %v185_v19, %v229_v33 }
  0x99   :  { %v230_v46 = vrot.slane %v161_v20, %v229_v33 }
  0x9a   :  { %v283_v56 = vsel %vm231_vm1, %v282_v42, %v278_v49  ;;  %v403_v42 = vld [vmem:[%s802_s1 + $0x18] sm:$0xff] }
  0x9b   :  { %v188_v22 = vpop.xlane.xlu1 %187  ;;  %v232_v61 = vsel %vm231_vm1, %v230_v46, %v225_v52 }
  0x9c   :  { %v164_v23 = vpop.xlane.xlu0 %163  ;;  %v287_v47 = vrot.slane %v188_v22, %v236_v36 }
  0x9d   :  { %v237_v50 = vrot.slane %v164_v23, %v236_v36  ;;  %v400_v36 = vld [vmem:[%s802_s1] sm:$0xff] }
  0x9e   :  { %v288_v62 = vsel %vm238_vm2, %v287_v47, %v283_v56 }
  0x9f   :  { %v191_v25 = vpop.xlane.xlu1 %190  ;;  %v239_v1 = vsel %vm238_vm2, %v237_v50, %v232_v61  ;;  %v405_v50 = vld [vmem:[%s802_s1 + $0x28] sm:$0xff] }
  0xa0   :  { %v167_v27 = vpop.xlane.xlu0 %166  ;;  %v292_v51 = vrot.slane %v191_v25, %v243_v39 }
  0xa1   :  { %v244_v53 = vrot.slane %v167_v27, %v243_v39 }
  0xa2   :  { %v293_v2 = vsel %vm245_vm3, %v292_v51, %v288_v62 }
  0xa3   :  { %v194_v32 = vpop.xlane.xlu1 %193  ;;  %v246_v4 = vsel %vm245_vm3, %v244_v53, %v239_v1 }
  0xa4   :  { %v170_v34 = vpop.xlane.xlu0 %169  ;;  %v297_v54 = vrot.slane %v194_v32, %v250_v40 }
  0xa5   :  { %v251_v57 = vrot.slane %v170_v34, %v250_v40 }
  0xa6   :  { %v298_v5 = vsel %vm252_vm4, %v297_v54, %v293_v2 }
  0xa7   :  { %v197_v41 = vpop.xlane.xlu1 %196  ;;  %v253_v7 = vsel %vm252_vm4, %v251_v57, %v246_v4 }
  0xa8   :  { %v173_v44 = vpop.xlane.xlu0 %172  ;;  %v302_v58 = vrot.slane %v197_v41, %v257_v43 }
  0xa9   :  { %v258_v63 = vrot.slane %v173_v44, %v257_v43  ;;  %v404_v44 = vld [vmem:[%s802_s1 + $0x20] sm:$0xff] }
  0xaa   :  { %v303_v8 = vsel %vm259_vm5, %v302_v58, %v298_v5 }
  0xab   :  { %v200_v55 = vpop.xlane.xlu1 %199  ;;  %v260_v11 = vsel %vm259_vm5, %v258_v63, %v253_v7 }
  0xac   :  { %v176_v59 = vpop.xlane.xlu0 %175  ;;  %v307_v0 = vrot.slane %v200_v55, %v264_v48 }
  0xad   :  { %v265_v3 = vrot.slane %v176_v59, %v264_v48 }
  0xae   :  { %v308_v12 = vsel %vm266_vm6, %v307_v0, %v303_v8  ;;  %v407_v8 = vld [vmem:[%s802_s1 + $0x38] sm:$0xff] }
  0xaf   :  { %v203_v6 = vpop.xlane.xlu1 %202  ;;  %v267_v14 = vsel %vm266_vm6, %v265_v3, %v260_v11 }
  0xb0   :  { %v312_v9 = vrot.slane %v203_v6, %v271_v60  ;;  %v179_v10 = vpop.xlane.xlu0 %178 }
  0xb1   :  { %v272_v13 = vrot.slane %v179_v10, %v271_v60  ;;  %v406_v60 = vld [vmem:[%s802_s1 + $0x30] sm:$0xff] }
  0xb2   :  { %v313_v15 = vsel %vm273_vm7, %v312_v9, %v308_v12 }
  0xb3   :  { %v274_v17 = vsel %vm273_vm7, %v272_v13, %v267_v14 }
  0xb4   :  { %v315_v18 = vsel %vm314_vm8, %v313_v15, %v274_v17 }
  0xb5   :  { %v317_v19 = vadd.f32 %v315_v18, %v155_v16 }
  0xb7   :  { %319 = vst.msk [vmem:[#allocation2] sm:$0x3] %vm25_vm0, %v317_v19 }
  0xbe   :  { %v323_v20 = vld [vmem:[#allocation2] sm:$0x3] }
  0xbf   :  { %v324_v21 = vmul.f32 0.00390625, %v323_v20 }
  0xc1   :  { %555 = vlog2.f32 %v324_v21 }
  0xce   :  { %v556_v22 = vpop.eup %555 }
  0xcf   :  { %v326_v23 = vmul.f32 0.6931472, %v556_v22 }
  0xd1   :  { %v327_v24 = vmul.f32 0.33333334, %v326_v23 }
  0xd3   :  { %v328_v25 = vmul.f32 1.442695, %v327_v24 }
  0xd5   :  { %557 = vpow2.f32 %v328_v25 }
  0xe2   :  { %v558_v27 = vpop.eup %557 }
  0xe3   :  { %v368_v28 = vrot.slane %v558_v27, %v367_v26  ;;  %v333_v31 = vrot.slane %v558_v27, %v742_v30 }
  0xe5   :  { %374 = vbcast.lane.b32.xlu1 %v368_v28, 264  ;;  %370 = vbcast.lane.b32.xlu0 %v368_v28, 256 }
  0xe9   :  { %378 = vbcast.lane.b32.xlu0 %v368_v28, 272  ;;  %335 = vbcast.lane.b32.xlu1 %v333_v31, 256 }
  0xed   :  { %382 = vbcast.lane.b32.xlu0 %v368_v28, 280  ;;  %339 = vbcast.lane.b32.xlu1 %v333_v31, 264 }
  0xf1   :  { %386 = vbcast.lane.b32.xlu0 %v368_v28, 288  ;;  %343 = vbcast.lane.b32.xlu1 %v333_v31, 272 }
  0xf5   :  { %390 = vbcast.lane.b32.xlu0 %v368_v28, 296  ;;  %347 = vbcast.lane.b32.xlu1 %v333_v31, 280 }
  0xf9   :  { %394 = vbcast.lane.b32.xlu0 %v368_v28, 304  ;;  %351 = vbcast.lane.b32.xlu1 %v333_v31, 288 }
  0xfd   :  { %398 = vbcast.lane.b32.xlu0 %v368_v28, 312  ;;  %355 = vbcast.lane.b32.xlu1 %v333_v31, 296 }
 0x101   :  { %359 = vbcast.lane.b32.xlu1 %v333_v31, 304 }
 0x105   :  { %363 = vbcast.lane.b32.xlu1 %v333_v31, 312 }
 0x157   :  { %v375_v29 = vpop.permute.xlu1 %374  ;;  %v371_v32 = vpop.permute.xlu0 %370 }
 0x158   :  { %v417_v40 = vmul.f32 %v401_v35, %v375_v29  ;;  %v416_v41 = vmul.f32 %v400_v36, %v371_v32 }
 0x15a   :  { %v447_v47 = vsel %vm424_vm9, %v417_v40, 0.0  ;;  %v446_v48 = vsel %vm424_vm9, %v416_v41, 0.0 }
 0x15b   :  { %v379_v33 = vpop.permute.xlu0 %378  ;;  %v336_v34 = vpop.permute.xlu1 %335  ;;  %v448_v53 = vadd.f32 %v447_v47, %v446_v48 }
 0x15c   :  { %v418_v43 = vmul.f32 %v402_v37, %v379_v33  ;;  %v408_v61 = vmul.f32 %v400_v36, %v336_v34 }
 0x15e   :  { %v449_v51 = vsel %vm424_vm9, %v418_v43, 0.0  ;;  %v425_v9 = vsel %vm424_vm9, %v408_v61, 0.0 }
 0x15f   :  { %v383_v38 = vpop.permute.xlu0 %382  ;;  %v340_v39 = vpop.permute.xlu1 %339  ;;  %v450_v59 = vadd.f32 %v449_v51, %v448_v53 }
 0x160   :  { %v419_v49 = vmul.f32 %v403_v42, %v383_v38  ;;  %v409_v57 = vmul.f32 %v401_v35, %v340_v39 }
 0x162   :  { %v451_v56 = vsel %vm424_vm9, %v419_v49, 0.0  ;;  %v426_v3 = vsel %vm424_vm9, %v409_v57, 0.0  ;;  %v492_v57 = vld [vmem:[%s804_s3] sm:$0xf]  ;;  %s590_s3 = smov [#allocation3]  }
 0x163   :  { %v387_v45 = vpop.permute.xlu0 %386  ;;  %v344_v46 = vpop.permute.xlu1 %343  ;;  %v452_v0 = vadd.f32 %v451_v56, %v450_v59  ;;  %v427_v13 = vadd.f32 %v426_v3, %v425_v9 }
 0x164   :  { %v420_v52 = vmul.f32 %v404_v44, %v387_v45  ;;  %v410_v63 = vmul.f32 %v402_v37, %v344_v46 }
 0x166   :  { %v453_v62 = vsel %vm424_vm9, %v420_v52, 0.0  ;;  %v428_v10 = vsel %vm424_vm9, %v410_v63, 0.0 }
 0x167   :  { %v391_v54 = vpop.permute.xlu0 %390  ;;  %v348_v55 = vpop.permute.xlu1 %347  ;;  %v454_v7 = vadd.f32 %v453_v62, %v452_v0  ;;  %v429_v20 = vadd.f32 %v428_v10, %v427_v13 }
 0x168   :  { %v421_v58 = vmul.f32 %v405_v50, %v391_v54  ;;  %v411_v5 = vmul.f32 %v403_v42, %v348_v55 }
 0x16a   :  { %v455_v4 = vsel %vm424_vm9, %v421_v58, 0.0  ;;  %v430_v17 = vsel %vm424_vm9, %v411_v5, 0.0 }
 0x16b   :  { %v395_v1 = vpop.permute.xlu0 %394  ;;  %v352_v2 = vpop.permute.xlu1 %351  ;;  %v456_v14 = vadd.f32 %v455_v4, %v454_v7  ;;  %v431_v24 = vadd.f32 %v430_v17, %v429_v20 }
 0x16c   :  { %v422_v6 = vmul.f32 %v406_v60, %v395_v1  ;;  %v412_v12 = vmul.f32 %v404_v44, %v352_v2  ;;  %v551_v44 = vld [vmem:[%s803_s2] ss:$0 sm:$0xff] }
 0x16e   :  { %v457_v11 = vsel %vm424_vm9, %v422_v6, 0.0  ;;  %v432_v22 = vsel %vm424_vm9, %v412_v12, 0.0 }
 0x16f   :  { %v399_v15 = vpop.permute.xlu0 %398  ;;  %v356_v16 = vpop.permute.xlu1 %355  ;;  %v458_v21 = vadd.f32 %v457_v11, %v456_v14  ;;  %v433_v31 = vadd.f32 %v432_v22, %v431_v24 }
 0x170   :  { %v423_v18 = vmul.f32 %v407_v8, %v399_v15  ;;  %v413_v19 = vmul.f32 %v405_v50, %v356_v16 }
 0x172   :  { %v459_v23 = vsel %vm424_vm9, %v423_v18, 0.0  ;;  %v434_v27 = vsel %vm424_vm9, %v413_v19, 0.0 }
 0x173   :  { %v460_v25 = vadd.f32 %v459_v23, %v458_v21  ;;  %v360_v26 = vpop.permute.xlu1 %359  ;;  %v435_v34 = vadd.f32 %v434_v27, %v433_v31 }
 0x174   :  { %v414_v28 = vmul.f32 %v406_v60, %v360_v26 }
 0x175   :  { %v461_v29 = vrot.slane %v460_v25, 4 }
 0x176   :  { %v436_v32 = vsel %vm424_vm9, %v414_v28, 0.0 }
 0x177   :  { %v462_v33 = vadd.f32 %v461_v29, %v460_v25  ;;  %v364_v35 = vpop.permute.xlu1 %363  ;;  %v437_v38 = vadd.f32 %v436_v32, %v435_v34 }
 0x178   :  { %v415_v36 = vmul.f32 %v407_v8, %v364_v35 }
 0x179   :  { %v463_v37 = vrot.slane %v462_v33, 2 }
 0x17a   :  { %v438_v39 = vsel %vm424_vm9, %v415_v36, 0.0 }
 0x17b   :  { %v464_v40 = vadd.f32 %v463_v37, %v462_v33  ;;  %v439_v41 = vadd.f32 %v438_v39, %v437_v38 }
 0x17d   :  { %v440_v42 = vrot.slane %v439_v41, 4  ;;  %v465_v43 = vrot.slane %v464_v40, 1 }
 0x17f   :  { %v441_v45 = vadd.f32 %v440_v42, %v439_v41  ;;  %v466_v46 = vadd.f32 %v465_v43, %v464_v40 }
 0x181   :  { %v442_v47 = vrot.slane %v441_v45, 2  ;;  %v475_v48 = vadd.f32 %v551_v44, %v466_v46 }
 0x183   :  { %v443_v49 = vadd.f32 %v442_v47, %v441_v45  ;;  %v477_v50 = vmax.f32 %v475_v48, 0.0 }
 0x185   :  { %v488_v51 = vrot.slane %v477_v50, %v742_v30  ;;  %v444_v52 = vrot.slane %v443_v49, 1 }
 0x187   :  { %490 = vbcast.lane.b32.xlu0 %v488_v51, 256  ;;  %v445_v53 = vadd.f32 %v444_v52, %v443_v49 }
 0x189   :  { %v474_v54 = vadd.f32 %v551_v44, %v445_v53 }
 0x18b   :  { %v476_v55 = vmax.f32 %v474_v54, 0.0 }
 0x18d   :  { %v481_v56 = vrot.slane %v476_v55, %v742_v30  ;;  %v552_v30 = vld [vmem:[%s805_s4] ss:$0 sm:$0xff]  ;;  %s543_s4 = sshll.u32 %s590_s3, 4  ;;  %s544_s4 = int_to_ptr.vmem [resolvable:$true] %s543_s4 }
 0x18e   :  { %s567_s26 = scalar_lea.vmem %s544_s4, 32  ;;  %p572_p1 = scmp.lt.s32.totalorder %s544_s4, %s544_s4 }
 0x18f   :  { %483 = vbcast.lane.b32.xlu1 %v481_v56, 256  ;;  %p568_p0 = scmp.ne.s32.totalorder %s544_s4, %s567_s26  ;;  %p573_p2 = scmp.lt.s32.totalorder %s567_s26, %s567_s26 }
 0x191   :  { %p574_p3 = por %p573_p2, %p572_p1 }
 0x193   :  { %p575_p4 = pnand %p574_p3, %p568_p0 }
 0x1f9   :  { %v491_v58 = vpop.permute.xlu0 %490 }
 0x1fa   :  { %v494_v59 = vmul.f32 %v492_v57, %v491_v58 }
 0x1fc   :  { %v503_v60 = vsel %vm495_vm10, %v494_v59, 0.0 }
 0x1fd   :  { %v504_v61 = vrot.slane %v503_v60, 4 }
 0x1ff   :  { %v505_v62 = vadd.f32 %v504_v61, %v503_v60 }
 0x201   :  { %v506_v63 = vrot.slane %v505_v62, 2  ;;  %v484_v0 = vpop.permute.xlu1 %483 }
 0x202   :  { %v493_v1 = vmul.f32 %v492_v57, %v484_v0 }
 0x203   :  { %v507_v2 = vadd.f32 %v506_v63, %v505_v62 }
 0x204   :  { %v496_v3 = vsel %vm495_vm10, %v493_v1, 0.0 }
 0x205   :  { %v508_v4 = vrot.slane %v507_v2, 1  ;;  %v497_v5 = vrot.slane %v496_v3, 4 }
 0x207   :  { %v509_v6 = vadd.f32 %v508_v4, %v507_v2  ;;  %v498_v7 = vadd.f32 %v497_v5, %v496_v3 }
 0x209   :  { %v518_v8 = vadd.f32 %v552_v30, %v509_v6  ;;  %v499_v9 = vrot.slane %v498_v7, 2 }
 0x20b   :  { %v520_v10 = vsub.f32 0.0, %v518_v8  ;;  %v500_v11 = vadd.f32 %v499_v9, %v498_v7 }
 0x20d   :  { %v523_v12 = vmul.f32 1.442695, %v520_v10  ;;  %v501_v13 = vrot.slane %v500_v11, 1 }
 0x20f   :  { %559 = vpow2.f32 %v523_v12  ;;  %v502_v14 = vadd.f32 %v501_v13, %v500_v11 }
 0x211   :  { %v517_v15 = vadd.f32 %v552_v30, %v502_v14 }
 0x213   :  { %v519_v16 = vsub.f32 0.0, %v517_v15 }
 0x215   :  { %v521_v17 = vmul.f32 1.442695, %v519_v16 }
 0x217   :  { %561 = vpow2.f32 %v521_v17 }
 0x21c   :  { %v560_v18 = vpop.eup %559 }
 0x21d   :  { %v526_v19 = vadd.f32 1.0, %v560_v18 }
 0x21f   :  { %563 = vrcp.f32 %v526_v19 }
 0x224   :  { %v562_v20 = vpop.eup %561 }
 0x225   :  { %v525_v21 = vadd.f32 1.0, %v562_v20 }
 0x227   :  { %565 = vrcp.f32 %v525_v21 }
 0x22c   :  { %v564_v22 = vpop.eup %563 }
 0x22d   :  { %v533_v23 = vrot.slane %v564_v22, 7 }
 0x234   :  { %v566_v24 = vpop.eup %565 }
 0x235   :  { %v534_v25 = vsel %vm314_vm8, %v533_v23, %v566_v24 }
 0x236   :  { %536 = vst.msk [vmem:[#allocation3] sm:$0x3] %vm25_vm0, %v534_v25 }
 0x237   :  { %578 = shalt.err (!%p575_p4)
}
 0x238   :  { %546 = dma.vmem_to_hbm [thread:$0]  %s544_s4, 32, %s806_s5, [#allocation4]  }
 0x239   :  { %587 = dma.done.wait [#allocation4], 32  }
 0x23a   :  { %588 = vsyncadd [#allocation4], 4294967264 }
 0x23b   :  { %550 = vsyncpa [#allocation4], 1 }

</bundles_post_ra>
